<compile_context>
chip_gen: v5e
topology: v5e:2x2
jax: 0.10.0
libtpu: 0.0.40
codegen_flags: <defaults>
</compile_context>

<pallas_src>
import jax
import jax.numpy as jnp
from jax.experimental import pallas as pl
from jax.experimental.pallas import tpu as pltpu


_MAX_TILE_ROWS = 512  # ~85% of HBM roofline already at 512-row tiles.


def _log_softmax_kernel(x_ref, o_ref):
    # x_ref / o_ref: one (tile_n, C) tile of rows; reduce over the last (lane)
    # axis.  Compute in f32 for stability, store in the output dtype.
    x = x_ref[...].astype(jnp.float32)
    m = jnp.max(x, axis=-1, keepdims=True)
    shifted = x - m
    lse = jnp.log(jnp.sum(jnp.exp(shifted), axis=-1, keepdims=True))
    o_ref[...] = (shifted - lse).astype(o_ref.dtype)


def _round_up(a, b):
    return ((a + b - 1) // b) * b


def _tpu_info():
    """(physical VMEM bytes per TensorCore, lowercase device kind string)."""
    kind = ""
    try:
        kind = jax.devices()[0].device_kind.lower()
    except Exception:
        pass
    phys = None
    try:
        phys = int(pltpu.get_tpu_info().vmem_capacity_bytes)
    except Exception:
        phys = None
    if not phys or phys <= 0:
        # Per-generation fallback: v5e/v6e have 128 MiB; be conservative
        # (v7x-safe 64 MiB) otherwise.
        phys = (128 << 20) if ("v5" in kind or "v6" in kind) else (64 << 20)
    return phys, kind


def _plan(n, c, dtype):
    """Pick (tile_n, vmem_limit_bytes, use_buffered_input)."""
    itemsize = jnp.dtype(dtype).itemsize
    # bf16/fp16 pack two rows per sublane -> align row tiles to 16; f32 to 8.
    row_align = 16 if itemsize == 2 else 8

    phys_vmem, kind = _tpu_info()
    # Raise the scoped VMEM limit (v5e default 16 MiB is too small); cap at
    # half of physical so v7x (64 MiB) keeps headroom -> 32 MiB on v7x,
    # 64 MiB on v5e/v6e.
    vmem_limit = min(phys_vmem // 2, 64 << 20)

    # v5e: lowest HBM bandwidth + single vector-store slot, so a third input
    # buffer helps hide per-step DMA latency (cheap in 128 MiB VMEM).
    use_buffered = "v5" in kind
    in_bufs = 3 if use_buffered else 2

    # Per-row VMEM footprint: pipelined input buffers + double-buffered output
    # tiles in the input dtype, plus ~3 f32 temporaries inside the kernel
    # (x, shifted, exp(shifted)) from the upcast.
    bytes_per_row = (in_bufs + 2) * c * itemsize + 3 * c * 4
    budget = int(vmem_limit * 0.6)  # leave headroom under the scoped limit

    rows = budget // max(bytes_per_row, 1)
    rows = (rows // row_align) * row_align
    if rows < row_align:
        # TODO(synk): blocked-C (two-pass / online logsumexp) path for
        # vocab-scale C where a single row block no longer fits in VMEM.
        raise ValueError(
            f"log_softmax_pallas: C={c} too wide for a single-row-block tile "
            f"under the {vmem_limit >> 20} MiB VMEM budget; blocked-C path "
            f"not implemented.")
    rows = min(rows, _MAX_TILE_ROWS)

    # Megacore (v7x has 2 TensorCores): make sure the parallel row axis has
    # >=2 grid blocks (ideally >=4) whenever N allows it.
    n_aligned = _round_up(n, row_align)
    if n_aligned >= 4 * row_align:
        target_blocks = 4
    elif n_aligned >= 2 * row_align:
        target_blocks = 2
    else:
        target_blocks = 1
    block_cap = _round_up(-(-n_aligned // target_blocks), row_align)

    tile_n = max(row_align, min(rows, block_cap, n_aligned))
    return tile_n, vmem_limit, use_buffered


def log_softmax_pallas(x):
    """log_softmax along dim=1 of a (N, C) array via a Pallas TPU kernel."""
    assert x.ndim == 2, "Net expects (N, C) logits; dim=1 is the class axis."
    n, c = x.shape
    dtype = x.dtype

    tile_n, vmem_limit, use_buffered = _plan(n, c, dtype)
    grid = (pl.cdiv(n, tile_n),)

    def build(in_spec):
        return pl.pallas_call(
            _log_softmax_kernel,
            out_shape=jax.ShapeDtypeStruct((n, c), dtype),
            grid_spec=pl.GridSpec(
                grid=grid,
                in_specs=[in_spec],
                # Full-extent C in the block (legal even if C % 128 != 0);
                # ragged last row block's OOB stores are dropped by Pallas.
                out_specs=pl.BlockSpec((tile_n, c), lambda i: (i, 0)),
            ),
            compiler_params=pltpu.CompilerParams(
                dimension_semantics=("parallel",),
                vmem_limit_bytes=vmem_limit,
            ),
        )

    if use_buffered:
        # v5e: 3-deep input pipeline; fall back silently if unsupported.
        try:
            spec3 = pl.BlockSpec((tile_n, c), lambda i: (i, 0),
                                 pipeline_mode=pl.Buffered(3))
            return build(spec3)(x)
        except Exception:
            pass

    plain_spec = pl.BlockSpec((tile_n, c), lambda i: (i, 0))
    return build(plain_spec)(x)


class Net:
    """JAX/Pallas equivalent of the PyTorch Net module (no parameters)."""

    def __init__(self):
        pass  # original module has no learnable parameters

    def __call__(self, x):
        return log_softmax_pallas(x)


if __name__ == "__main__":
    key = jax.random.PRNGKey(0)
    net = Net()

    # Small logits tensor: batch=8, classes=32 (dim=1 is the class axis).
    x = jax.random.normal(key, (8, 32), dtype=jnp.float32)
    out = jax.block_until_ready(net(x))
    ref = jax.nn.log_softmax(x, axis=1)
    assert out.shape == x.shape
    assert jnp.allclose(out, ref, atol=1e-5, rtol=1e-5), "mismatch vs reference"

    # Non-aligned shape exercising the ragged row block + non-128 lane path.
    x2 = jax.random.normal(jax.random.PRNGKey(1), (10, 33), dtype=jnp.float32)
    out2 = jax.block_until_ready(net(x2))
    ref2 = jax.nn.log_softmax(x2, axis=1)
    assert out2.shape == x2.shape
    assert jnp.allclose(out2, ref2, atol=1e-5, rtol=1e-5), "mismatch vs reference (ragged)"

    print("KERNEL_OK")
</pallas_src>

<mosaic_0001>
module attributes {stable_mosaic.version = 11 : i64} {
  func.func @_log_softmax_kernel(%arg0: i32, %arg1: memref<8x32xf32, #tpu.memory_space<vmem>>, %arg2: memref<8x32xf32, #tpu.memory_space<vmem>>) attributes {dimension_semantics = [#tpu.dimension_semantics<parallel>], iteration_bounds = array<i64: 1>, scalar_prefetch = 0 : i64, scratch_operands = 0 : i64, tpu.core_type = #tpu.core_type<tc>, window_params = [{transform_indices = @transform_0, window_bounds = array<i64: 8, 32>}, {transform_indices = @transform_1, window_bounds = array<i64: 8, 32>}]} {
    %c0 = arith.constant 0 : index
    %c0_0 = arith.constant 0 : index
    %0 = vector.load %arg1[%c0, %c0_0] : memref<8x32xf32, #tpu.memory_space<vmem>>, vector<8x32xf32>
    %cst = arith.constant dense<0xFF800000> : vector<8xf32>
    %1 = vector.multi_reduction <maximumf>, %0, %cst [1] : vector<8x32xf32> to vector<8xf32>
    %2 = vector.shape_cast %1 : vector<8xf32> to vector<8x1xf32>
    %3 = vector.broadcast %2 : vector<8x1xf32> to vector<8x32xf32>
    %4 = arith.subf %0, %3 : vector<8x32xf32>
    %5 = math.exp %4 : vector<8x32xf32>
    %cst_1 = arith.constant dense<0.000000e+00> : vector<8xf32>
    %6 = vector.multi_reduction <add>, %5, %cst_1 [1] : vector<8x32xf32> to vector<8xf32>
    %7 = vector.shape_cast %6 : vector<8xf32> to vector<8x1xf32>
    %8 = math.log %7 : vector<8x1xf32>
    %9 = vector.broadcast %8 : vector<8x1xf32> to vector<8x32xf32>
    %10 = arith.subf %4, %9 : vector<8x32xf32>
    %c0_2 = arith.constant 0 : index
    %c0_3 = arith.constant 0 : index
    %11 = vector.load %arg2[%c0_2, %c0_3] : memref<8x32xf32, #tpu.memory_space<vmem>>, vector<8x32xf32>
    tpu.vector_store %arg2[%c0_2, %c0_3], %10 {strides = array<i32>} : memref<8x32xf32, #tpu.memory_space<vmem>>, vector<8x32xf32>,
    return
  }
  func.func @transform_0(%arg0: i32) -> (i32, i32) {
    %c0_i32 = arith.constant 0 : i32
    %c0_i32_0 = arith.constant 0 : i32
    return %arg0, %c0_i32 : i32, i32
  }
  func.func @transform_1(%arg0: i32) -> (i32, i32) {
    %c0_i32 = arith.constant 0 : i32
    %c0_i32_0 = arith.constant 0 : i32
    return %arg0, %c0_i32 : i32, i32
  }
}

</mosaic_0001>

<bundles_post_ra>
// kernel: tpu_custom_call.1
= control target key start
LH: loop header
LB: loop body
LE: loop exit
PB: predicated region body
PF: predicated region fallthrough
CT: control target
= control target key end

     0   :  { %6 = vsyncpa [#allocation3], 0  ;;  %s134_s0 = inlined_call_operand.hbm [shape: f32[8,32], index: 0, kind: input, shape index: {}]   ;;  %s135_s1 = inlined_call_operand.hbm [shape: f32[8,32], index: 1, kind: output, shape index: {}]  }
   0x1   :  { %7 = vsyncpa [#allocation4], 0  ;;  %s13_s8 = sshll.u32 %s134_s0, 4  ;;  %s113_s9 = smov [#allocation2]   ;;  %s14_s8 = int_to_ptr.hbm [resolvable:$true] %s13_s8 }
   0x2   :  { %s15_s10 = sshll.u32 %s113_s9, 4  ;;  %s16_s10 = int_to_ptr.vmem [resolvable:$true] %s15_s10 }
   0x3   :  { %18 = dma.hbm_to_vmem [thread:$0]  %s14_s8, 128, %s16_s10, [#allocation3]  }
   0x4   :  { %109 = dma.done.wait [#allocation3], 128  }
   0x5   :  { %110 = vsyncadd [#allocation3], 4294967168  ;;  %vm24_vm0 = vcmask 261120   ;;  %v23_v0 = vld [vmem:[#allocation2] sm:$0xff]  ;;  %s114_s0 = smov [#allocation5]   ;;  %s45_s14 = sshll.u32 %s135_s1, 4  ;;  %s46_s14 = int_to_ptr.hbm [resolvable:$true] %s45_s14 }
   0x6   :  { %v25_v1 = vsel %vm24_vm0, %v23_v0, -inf  ;;  %s43_s11 = sshll.u32 %s114_s0, 4  ;;  %s44_s11 = int_to_ptr.vmem [resolvable:$true] %s43_s11 }
   0x7   :  { %26 = vmax.xlane.f32.xlu0 %v25_v1 }
  0x7a   :  { %v27_v2 = vpop.xlane.xlu0 %26 }
  0x7b   :  { %v28_v3 = vsub.f32 %v23_v0, %v27_v2 }
  0x7d   :  { %v29_v4 = vmul.f32 1.442695, %v28_v3 }
  0x7f   :  { %57 = vpow2.f32 %v29_v4 }
  0x85   :  { %v58_v5 = vpop.eup %57 }
  0x86   :  { %v31_v6 = vsel %vm24_vm0, %v58_v5, 0.0 }
  0x87   :  { %32 = vadd.xlane.f32.xlu0 %v31_v6 }
  0xfa   :  { %v33_v7 = vpop.xlane.xlu0 %32 }
  0xfb   :  { %59 = vlog2.f32 %v33_v7 }
 0x101   :  { %v60_v8 = vpop.eup %59 }
 0x102   :  { %v35_v9 = vmul.f32 0.6931472, %v60_v8 }
 0x104   :  { %v36_v10 = vsub.f32 %v28_v3, %v35_v9 }
 0x106   :  { %37 = vst.msk [vmem:[#allocation5] sm:$0xff] %vm24_vm0, %v36_v10 }
 0x107   :  { %48 = dma.vmem_to_hbm [thread:$0]  %s44_s11, 128, %s46_s14, [#allocation4]  }
 0x108   :  { %111 = dma.done.wait [#allocation4], 128  }
 0x109   :  { %112 = vsyncadd [#allocation4], 4294967168 }
 0x10a   :  { %53 = vsyncpa [#allocation3], 1 }
 0x10b   :  { %54 = vsyncpa [#allocation4], 1 }

</bundles_post_ra>
